<compile_context>
chip_gen: v6e
topology: v6e:2x2x1
jax: 0.10.0
libtpu: 0.0.40
codegen_flags: <defaults>
</compile_context>

<pallas_src>
import jax
import jax.numpy as jnp
from jax import lax
from jax.experimental import pallas as pl
from jax.experimental.pallas import tpu as pltpu

# ---- problem sizes (small, consistent with a [N_points, D_features] dataset) ----
N = 1024      # number of data points (wavelength x phase samples)
D = 32        # feature dimension per data point
K = 3         # number of registered amplitudes (planets)
NP = 8        # packed row count: K amps + instrument + electronics + padding

B_INST = 0.05   # instrument bias (scalar)
B_ELEC = -2.0   # electronics bias (scalar)

I_INST = K       # packed row index of the instrument weights
I_ELEC = K + 1   # packed row index of the electronics weights


def amplitude_kernel(x_ref, w_ref, b_ref, o_ref):
    # x_ref: (TN, D) natural layout, w_ref: (NP, D), b_ref: (NP, 1).
    # One MXU matmul (contracting D on both sides) yields every per-point dot
    # product: the K amplitude rows, the instrument row and the electronics row.
    z = lax.dot_general(
        w_ref[...], x_ref[...],
        dimension_numbers=(((1,), (1,)), ((), ())),
        preferred_element_type=jnp.float32,
    )                                                                 # (NP, TN)
    z = z + b_ref[...]                                                # (NP, 1) bias

    # sum of the K planet amplitudes: relu + NaN-safe masked sublane reduction.
    row = lax.broadcasted_iota(jnp.int32, (NP, 1), 0)
    amp_sum = jnp.sum(jnp.where(row < K, jnp.maximum(z, 0.0), 0.0),
                      axis=0, keepdims=True)                          # (1, TN)

    # instrument(data): per-point throughput factor.
    inst = 1.0 + 0.1 * jnp.tanh(z[I_INST:I_INST + 1, :])              # (1, TN)

    # electronics(data): per-point noise floor (softplus).
    elec = jnp.logaddexp(z[I_ELEC:I_ELEC + 1, :], 0.0)                # (1, TN)

    o_ref[...] = amp_sum * inst + elec                                # lane-dense store


def _choose_tn(n):
    """Pick the data-points tile size.

    Small problems: a single grid step (per-step fixed overhead ~0.35us would
    dominate any split).  Large problems: the biggest lane-dense tile <= 32768
    that still gives >= 2 grid steps, so v7x's second TensorCore and the
    software pipeline both engage while per-tile DMA time >> step overhead.
    """
    if n <= 4096:
        return n
    best, t = 128, 128
    cap = min(32768, n // 2)
    while t <= cap:
        if n % t == 0:
            best = t
        t += 128
    return best


def amplitude_creator_forward(data, w_packed, b_packed):
    """data: (N, D) f32 (natural layout); w_packed: (NP, D); b_packed: (NP, 1).
    Returns (N,) f32."""
    n, d = data.shape
    tn = _choose_tn(n)
    assert n % tn == 0, "N must be divisible by the chosen tile size"
    num_steps = n // tn

    # Invariant operands (constant index_map): single-buffer them once the grid
    # actually iterates; at grid=(1,) default buffering is already minimal.
    invariant_kw = {} if num_steps == 1 else {"pipeline_mode": pl.Buffered(1)}
    w_spec = pl.BlockSpec((NP, d), lambda i: (0, 0), **invariant_kw)
    b_spec = pl.BlockSpec((NP, 1), lambda i: (0, 0), **invariant_kw)

    out = pl.pallas_call(
        amplitude_kernel,
        out_shape=jax.ShapeDtypeStruct((1, n), jnp.float32),
        grid_spec=pltpu.PrefetchScalarGridSpec(
            num_scalar_prefetch=0,
            grid=(num_steps,),
            in_specs=[
                pl.BlockSpec((tn, d), lambda i: (i, 0)),   # data tile, natural (N, D)
                w_spec,                                    # packed weights (resident)
                b_spec,                                    # packed biases (resident)
            ],
            out_specs=pl.BlockSpec((1, tn), lambda i: (0, i)),
        ),
        compiler_params=pltpu.CompilerParams(
            dimension_semantics=("parallel",),
        ),
        cost_estimate=pl.CostEstimate(
            flops=2 * NP * d * n,
            transcendentals=2 * n,
            bytes_accessed=4 * (n * d + NP * d + NP + n),
        ),
    )(data, w_packed, b_packed)
    return out.reshape(n)


def reference_forward(data, w_amp, b_amp, w_inst, w_elec):
    # mirrors: torch.sum(torch.stack([amp(data) for amp in amps]), 0)
    #          * instrument(data) + electronics(data)
    amp_outs = jnp.stack(
        [jnp.maximum(data @ w_amp[k] + b_amp[k], 0.0) for k in range(K)], axis=0
    )
    amp_sum = jnp.sum(amp_outs, axis=0)
    inst = 1.0 + 0.1 * jnp.tanh(data @ w_inst + B_INST)
    elec = jax.nn.softplus(data @ w_elec + B_ELEC)
    return amp_sum * inst + elec


if __name__ == "__main__":
    key = jax.random.PRNGKey(0)
    k_data, k_wamp, k_bamp, k_inst, k_elec = jax.random.split(key, 5)

    data = jax.random.normal(k_data, (N, D), dtype=jnp.float32)

    # deterministic synthetic parameters (shapes implied by the module's sub-models)
    w_amp_real = 0.1 * jax.random.normal(k_wamp, (K, D), dtype=jnp.float32)
    b_amp_real = 0.1 * jax.random.normal(k_bamp, (K,), dtype=jnp.float32)
    w_inst = 0.1 * jax.random.normal(k_inst, (D,), dtype=jnp.float32)
    w_elec = 0.1 * jax.random.normal(k_elec, (D,), dtype=jnp.float32)

    # pack all per-point dot products into one (NP, D) weight matrix + (NP, 1) bias
    w_packed = jnp.zeros((NP, D), jnp.float32)
    w_packed = w_packed.at[:K, :].set(w_amp_real)
    w_packed = w_packed.at[I_INST, :].set(w_inst)
    w_packed = w_packed.at[I_ELEC, :].set(w_elec)
    b_packed = jnp.zeros((NP, 1), jnp.float32)
    b_packed = b_packed.at[:K, 0].set(b_amp_real)
    b_packed = b_packed.at[I_INST, 0].set(B_INST)
    b_packed = b_packed.at[I_ELEC, 0].set(B_ELEC)

    out = amplitude_creator_forward(data, w_packed, b_packed)
    out = jax.block_until_ready(out)

    ref = reference_forward(data, w_amp_real, b_amp_real, w_inst, w_elec)
    assert out.shape == (N,)
    assert jnp.allclose(out, ref, atol=1e-4, rtol=1e-4), "mismatch vs reference"

    # TODO(synk): real nullingexplorer amplitudes (transmission maps, orbits,
    # spectra) depend on a model registry + config; only the fused
    # stack/sum * instrument + electronics hot path is reproduced here.

    print("KERNEL_OK")
</pallas_src>

<mosaic_0001>
module attributes {stable_mosaic.version = 11 : i64} {
  func.func @amplitude_kernel(%arg0: i32, %arg1: memref<1024x32xf32, #tpu.memory_space<vmem>>, %arg2: memref<8x32xf32, #tpu.memory_space<vmem>>, %arg3: memref<8x1xf32, #tpu.memory_space<vmem>>, %arg4: memref<1x1024xf32, #tpu.memory_space<vmem>>) attributes {dimension_semantics = [#tpu.dimension_semantics<parallel>], iteration_bounds = array<i64: 1>, scalar_prefetch = 0 : i64, scratch_operands = 0 : i64, tpu.core_type = #tpu.core_type<tc>, window_params = [{transform_indices = @transform_0, window_bounds = array<i64: 1024, 32>}, {pipeline_mode = #tpu.pipeline_mode<synchronous>, transform_indices = @transform_1, window_bounds = array<i64: 8, 32>}, {pipeline_mode = #tpu.pipeline_mode<synchronous>, transform_indices = @transform_2, window_bounds = array<i64: 8, 1>}, {transform_indices = @transform_3, window_bounds = array<i64: 1, 1024>}]} {
    %c0 = arith.constant 0 : index
    %c0_0 = arith.constant 0 : index
    %0 = vector.load %arg2[%c0, %c0_0] : memref<8x32xf32, #tpu.memory_space<vmem>>, vector<8x32xf32>
    %c0_1 = arith.constant 0 : index
    %c0_2 = arith.constant 0 : index
    %1 = vector.load %arg1[%c0_1, %c0_2] : memref<1024x32xf32, #tpu.memory_space<vmem>>, vector<1024x32xf32>
    %cst = arith.constant dense<0.000000e+00> : vector<8x1024xf32>
    %2 = tpu.matmul %0, %1, %cst {dimension_numbers = #tpu.dot_dimension_numbers<[1], [1], [0], [0], [0, 0, 1, 0], [], []>} : vector<8x32xf32>, vector<1024x32xf32>, vector<8x1024xf32> -> vector<8x1024xf32>
    %c0_3 = arith.constant 0 : index
    %c0_4 = arith.constant 0 : index
    %3 = vector.load %arg3[%c0_3, %c0_4] : memref<8x1xf32, #tpu.memory_space<vmem>>, vector<8x1xf32>
    %4 = vector.broadcast %3 : vector<8x1xf32> to vector<8x1024xf32>
    %5 = arith.addf %2, %4 : vector<8x1024xf32>
    %6 = tpu.iota {dimensions = array<i32: 0>} : vector<8x1xi32>
    %c3_i32 = arith.constant 3 : i32
    %7 = vector.broadcast %c3_i32 : i32 to vector<8x1xi32>
    %8 = arith.cmpi slt, %6, %7 : vector<8x1xi32>
    %cst_5 = arith.constant 0.000000e+00 : f32
    %9 = vector.broadcast %cst_5 : f32 to vector<8x1024xf32>
    %10 = arith.maximumf %5, %9 : vector<8x1024xf32>
    %cst_6 = arith.constant 0.000000e+00 : f32
    %11 = vector.shape_cast %8 : vector<8x1xi1> to vector<8x1xi1>
    %12 = vector.broadcast %11 : vector<8x1xi1> to vector<8x1024xi1>
    %13 = vector.broadcast %cst_6 : f32 to vector<8x1024xf32>
    %14 = arith.select %12, %10, %13 : vector<8x1024xi1>, vector<8x1024xf32>
    %cst_7 = arith.constant dense<0.000000e+00> : vector<1024xf32>
    %15 = vector.multi_reduction <add>, %14, %cst_7 [0] : vector<8x1024xf32> to vector<1024xf32>
    %16 = vector.shape_cast %15 : vector<1024xf32> to vector<1x1024xf32>
    %17 = vector.extract_strided_slice %5 {offsets = [3, 0], sizes = [1, 1024], strides = [1, 1]} : vector<8x1024xf32> to vector<1x1024xf32>
    %18 = math.tanh %17 : vector<1x1024xf32>
    %cst_8 = arith.constant 1.000000e-01 : f32
    %19 = vector.broadcast %cst_8 : f32 to vector<1x1024xf32>
    %20 = arith.mulf %19, %18 : vector<1x1024xf32>
    %cst_9 = arith.constant 1.000000e+00 : f32
    %21 = vector.broadcast %cst_9 : f32 to vector<1x1024xf32>
    %22 = arith.addf %21, %20 : vector<1x1024xf32>
    %23 = vector.extract_strided_slice %5 {offsets = [4, 0], sizes = [1, 1024], strides = [1, 1]} : vector<8x1024xf32> to vector<1x1024xf32>
    %cst_10 = arith.constant 0.000000e+00 : f32
    %24 = vector.broadcast %cst_10 : f32 to vector<1x1024xf32>
    %25 = arith.maximumf %23, %24 : vector<1x1024xf32>
    %26 = vector.broadcast %cst_10 : f32 to vector<1x1024xf32>
    %27 = arith.subf %23, %26 : vector<1x1024xf32>
    %28 = arith.cmpf one, %27, %27 : vector<1x1024xf32>
    %29 = vector.broadcast %cst_10 : f32 to vector<1x1024xf32>
    %30 = arith.addf %23, %29 : vector<1x1024xf32>
    %31 = math.absf %27 : vector<1x1024xf32>
    %cst_11 = arith.constant 0.000000e+00 : f32
    %32 = vector.broadcast %cst_11 : f32 to vector<1x1024xf32>
    %33 = arith.subf %32, %31 : vector<1x1024xf32>
    %34 = math.exp %33 : vector<1x1024xf32>
    %35 = math.log1p %34 : vector<1x1024xf32>
    %36 = arith.addf %25, %35 : vector<1x1024xf32>
    %37 = arith.select %28, %30, %36 : vector<1x1024xi1>, vector<1x1024xf32>
    %38 = arith.mulf %16, %22 : vector<1x1024xf32>
    %39 = arith.addf %38, %37 : vector<1x1024xf32>
    %c0_12 = arith.constant 0 : index
    %c0_13 = arith.constant 0 : index
    %40 = vector.load %arg4[%c0_12, %c0_13] : memref<1x1024xf32, #tpu.memory_space<vmem>>, vector<1x1024xf32>
    tpu.vector_store %arg4[%c0_12, %c0_13], %39 {strides = array<i32>} : memref<1x1024xf32, #tpu.memory_space<vmem>>, vector<1x1024xf32>,
    return
  }
  func.func @transform_0(%arg0: i32) -> (i32, i32) {
    %c0_i32 = arith.constant 0 : i32
    %c0_i32_0 = arith.constant 0 : i32
    return %arg0, %c0_i32 : i32, i32
  }
  func.func @transform_1(%arg0: i32) -> (i32, i32) {
    %c0_i32 = arith.constant 0 : i32
    %c0_i32_0 = arith.constant 0 : i32
    %c0_i32_1 = arith.constant 0 : i32
    return %c0_i32, %c0_i32_0 : i32, i32
  }
  func.func @transform_2(%arg0: i32) -> (i32, i32) {
    %c0_i32 = arith.constant 0 : i32
    %c0_i32_0 = arith.constant 0 : i32
    %c0_i32_1 = arith.constant 0 : i32
    return %c0_i32, %c0_i32_0 : i32, i32
  }
  func.func @transform_3(%arg0: i32) -> (i32, i32) {
    %c0_i32 = arith.constant 0 : i32
    %c0_i32_0 = arith.constant 0 : i32
    return %c0_i32, %arg0 : i32, i32
  }
}

</mosaic_0001>

<bundles_post_ra>
// kernel: tpu_custom_call.1
= control target key start
LH: loop header
LB: loop body
LE: loop exit
PB: predicated region body
PF: predicated region fallthrough
CT: control target
= control target key end

     0   :  { %vm150_vm0 = vcmask 261120   ;;  %v1506_v10 = vmov 0   ;;  %s2330_s0 = inlined_call_operand.vmem [shape: f32[1024,32], index: 0, kind: input, shape index: {}]   ;;  %s2331_s1 = inlined_call_operand.vmem [shape: f32[8,32], index: 1, kind: input, shape index: {}]   ;;  %s2332_s2 = inlined_call_operand.vmem [shape: f32[8,1], index: 2, kind: input, shape index: {}]   ;;  %s2333_s3 = inlined_call_operand.hbm [shape: f32[1,1024], index: 3, kind: output, shape index: {}]  }
   0x1   :  { %v47_v0 = vld [vmem:[%s2330_s0 + $0xf8] sm:$0xff]  ;;  %v46_v4 = vld [vmem:[%s2330_s0 + $0xf0] sm:$0xff]  ;;  %v45_v8 = vld [vmem:[%s2330_s0 + $0xe8] sm:$0xff]  ;;  %1435 = vset.pattern.permute.xlu0 %v1506_v10 }
   0x2   :  { %v79_v1 = vld [vmem:[%s2330_s0 + $0x1f8] sm:$0xff]  ;;  %1296 = vmatprep.subr.msk.mxu0 %vm150_vm0, %v47_v0  ;;  %v78_v5 = vld [vmem:[%s2330_s0 + $0x1f0] sm:$0xff]  ;;  %v77_v9 = vld [vmem:[%s2330_s0 + $0x1e8] sm:$0xff] }
   0x3   :  { %v31_v2 = vld [vmem:[%s2330_s0 + $0x78] sm:$0xff]  ;;  %1330 = vmatprep.subr.msk.mxu1 %vm150_vm0, %v79_v1  ;;  %v30_v6 = vld [vmem:[%s2330_s0 + $0x70] sm:$0xff]  ;;  %v29_v11 = vld [vmem:[%s2330_s0 + $0x68] sm:$0xff] }
   0x4   :  { %v63_v3 = vld [vmem:[%s2330_s0 + $0x178] sm:$0xff]  ;;  %1297 = vmatpush3.xpose.msk.msra.mxu0 %vm150_vm0, %v31_v2  ;;  %v62_v7 = vld [vmem:[%s2330_s0 + $0x170] sm:$0xff]  ;;  %v61_v12 = vld [vmem:[%s2330_s0 + $0x168] sm:$0xff] }
   0x5   :  { %1331 = vmatpush3.xpose.msk.msra.mxu1 %vm150_vm0, %v63_v3  ;;  %1298 = vmatprep.subr.msk.mxu0 %vm150_vm0, %v46_v4  ;;  %v44_v13 = vld [vmem:[%s2330_s0 + $0xe0] sm:$0xff]  ;;  %v43_v17 = vld [vmem:[%s2330_s0 + $0xd8] sm:$0xff]  ;;  %v42_v21 = vld [vmem:[%s2330_s0 + $0xd0] sm:$0xff] }
   0x6   :  { %1332 = vmatprep.subr.msk.mxu1 %vm150_vm0, %v78_v5  ;;  %v76_v14 = vld [vmem:[%s2330_s0 + $0x1e0] sm:$0xff]  ;;  %v75_v18 = vld [vmem:[%s2330_s0 + $0x1d8] sm:$0xff]  ;;  %v74_v22 = vld [vmem:[%s2330_s0 + $0x1d0] sm:$0xff] }
   0x7   :  { %v28_v15 = vld [vmem:[%s2330_s0 + $0x60] sm:$0xff]  ;;  %v27_v19 = vld [vmem:[%s2330_s0 + $0x58] sm:$0xff]  ;;  %v26_v23 = vld [vmem:[%s2330_s0 + $0x50] sm:$0xff] }
   0x8   :  { %1299 = vmatpush3.xpose.msk.msra.mxu0 %vm150_vm0, %v30_v6  ;;  %v60_v16 = vld [vmem:[%s2330_s0 + $0x160] sm:$0xff]  ;;  %v59_v20 = vld [vmem:[%s2330_s0 + $0x158] sm:$0xff]  ;;  %v58_v24 = vld [vmem:[%s2330_s0 + $0x150] sm:$0xff] }
   0x9   :  { %1333 = vmatpush3.xpose.msk.msra.mxu1 %vm150_vm0, %v62_v7  ;;  %1300 = vmatprep.subr.msk.mxu0 %vm150_vm0, %v45_v8  ;;  %v41_v25 = vld [vmem:[%s2330_s0 + $0xc8] sm:$0xff]  ;;  %v1632_v27 = vld [vmem:[%s2331_s1] sm:$0xff]  ;;  %v39_v34 = vld [vmem:[%s2330_s0 + $0xb8] sm:$0xff] }
   0xa   :  { %1334 = vmatprep.subr.msk.mxu1 %vm150_vm0, %v77_v9  ;;  %v73_v26 = vld [vmem:[%s2330_s0 + $0x1c8] sm:$0xff]  ;;  %v40_v30 = vld [vmem:[%s2330_s0 + $0xc0] sm:$0xff]  ;;  %1328 = vmatprep.mubr.msk.f32.mxu0 %vm150_vm0, %v1632_v27  ;;  %v71_v35 = vld [vmem:[%s2330_s0 + $0x1b8] sm:$0xff] }
   0xb   :  { %v25_v28 = vld [vmem:[%s2330_s0 + $0x48] sm:$0xff]  ;;  %v72_v31 = vld [vmem:[%s2330_s0 + $0x1c0] sm:$0xff]  ;;  %1362 = vmatprep.mubr.msk.f32.mxu1 %vm150_vm0, %v1632_v27  ;;  %v23_v36 = vld [vmem:[%s2330_s0 + $0x38] sm:$0xff] }
   0xc   :  { %1301 = vmatpush3.xpose.msk.msra.mxu0 %vm150_vm0, %v29_v11  ;;  %v57_v29 = vld [vmem:[%s2330_s0 + $0x148] sm:$0xff]  ;;  %v24_v32 = vld [vmem:[%s2330_s0 + $0x40] sm:$0xff]  ;;  %v55_v37 = vld [vmem:[%s2330_s0 + $0x138] sm:$0xff] }
   0xd   :  { %1335 = vmatpush3.xpose.msk.msra.mxu1 %vm150_vm0, %v61_v12  ;;  %1302 = vmatprep.subr.msk.mxu0 %vm150_vm0, %v44_v13  ;;  %v56_v33 = vld [vmem:[%s2330_s0 + $0x140] sm:$0xff]  ;;  %v38_v38 = vld [vmem:[%s2330_s0 + $0xb0] sm:$0xff]  ;;  %v37_v42 = vld [vmem:[%s2330_s0 + $0xa8] sm:$0xff] }
   0xe   :  { %1336 = vmatprep.subr.msk.mxu1 %vm150_vm0, %v76_v14  ;;  %v70_v39 = vld [vmem:[%s2330_s0 + $0x1b0] sm:$0xff]  ;;  %v69_v43 = vld [vmem:[%s2330_s0 + $0x1a8] sm:$0xff]  ;;  %v36_v46 = vld [vmem:[%s2330_s0 + $0xa0] sm:$0xff] }
   0xf   :  { %v22_v40 = vld [vmem:[%s2330_s0 + $0x30] sm:$0xff]  ;;  %v21_v44 = vld [vmem:[%s2330_s0 + $0x28] sm:$0xff]  ;;  %v68_v47 = vld [vmem:[%s2330_s0 + $0x1a0] sm:$0xff] }
  0x10   :  { %1303 = vmatpush3.xpose.msk.msra.mxu0 %vm150_vm0, %v28_v15  ;;  %v54_v41 = vld [vmem:[%s2330_s0 + $0x130] sm:$0xff]  ;;  %v53_v45 = vld [vmem:[%s2330_s0 + $0x128] sm:$0xff]  ;;  %v20_v48 = vld [vmem:[%s2330_s0 + $0x20] sm:$0xff] }
  0x11   :  { %1337 = vmatpush3.xpose.msk.msra.mxu1 %vm150_vm0, %v60_v16  ;;  %1304 = vmatprep.subr.msk.mxu0 %vm150_vm0, %v43_v17  ;;  %v52_v49 = vld [vmem:[%s2330_s0 + $0x120] sm:$0xff] }
  0x12   :  { %1338 = vmatprep.subr.msk.mxu1 %vm150_vm0, %v75_v18  ;;  %v144_v50 = vld [vmem:[%s2332_s2] sm:$0xff] }
  0x14   :  { %1305 = vmatpush3.xpose.msk.msra.mxu0 %vm150_vm0, %v27_v19 }
  0x15   :  { %1339 = vmatpush3.xpose.msk.msra.mxu1 %vm150_vm0, %v59_v20  ;;  %1306 = vmatprep.subr.msk.mxu0 %vm150_vm0, %v42_v21 }
  0x16   :  { %1340 = vmatprep.subr.msk.mxu1 %vm150_vm0, %v74_v22 }
  0x18   :  { %1307 = vmatpush3.xpose.msk.msra.mxu0 %vm150_vm0, %v26_v23 }
  0x19   :  { %1341 = vmatpush3.xpose.msk.msra.mxu1 %vm150_vm0, %v58_v24  ;;  %1308 = vmatprep.subr.msk.mxu0 %vm150_vm0, %v41_v25 }
  0x1a   :  { %1342 = vmatprep.subr.msk.mxu1 %vm150_vm0, %v73_v26 }
  0x1c   :  { %1309 = vmatpush3.xpose.msk.msra.mxu0 %vm150_vm0, %v25_v28 }
  0x1d   :  { %1343 = vmatpush3.xpose.msk.msra.mxu1 %vm150_vm0, %v57_v29  ;;  %1310 = vmatprep.subr.msk.mxu0 %vm150_vm0, %v40_v30 }
  0x1e   :  { %1344 = vmatprep.subr.msk.mxu1 %vm150_vm0, %v72_v31 }
  0x20   :  { %1311 = vmatpush3.xpose.msk.msra.mxu0 %vm150_vm0, %v24_v32 }
  0x21   :  { %1345 = vmatpush3.xpose.msk.msra.mxu1 %vm150_vm0, %v56_v33  ;;  %1312 = vmatprep.subr.msk.mxu0 %vm150_vm0, %v39_v34 }
  0x22   :  { %1346 = vmatprep.subr.msk.mxu1 %vm150_vm0, %v71_v35 }
  0x24   :  { %1313 = vmatpush3.xpose.msk.msra.mxu0 %vm150_vm0, %v23_v36 }
  0x25   :  { %1347 = vmatpush3.xpose.msk.msra.mxu1 %vm150_vm0, %v55_v37  ;;  %1314 = vmatprep.subr.msk.mxu0 %vm150_vm0, %v38_v38 }
  0x26   :  { %1348 = vmatprep.subr.msk.mxu1 %vm150_vm0, %v70_v39 }
  0x28   :  { %1315 = vmatpush3.xpose.msk.msra.mxu0 %vm150_vm0, %v22_v40 }
  0x29   :  { %1349 = vmatpush3.xpose.msk.msra.mxu1 %vm150_vm0, %v54_v41  ;;  %1316 = vmatprep.subr.msk.mxu0 %vm150_vm0, %v37_v42 }
  0x2a   :  { %1350 = vmatprep.subr.msk.mxu1 %vm150_vm0, %v69_v43 }
  0x2c   :  { %1317 = vmatpush3.xpose.msk.msra.mxu0 %vm150_vm0, %v21_v44 }
  0x2d   :  { %1351 = vmatpush3.xpose.msk.msra.mxu1 %vm150_vm0, %v53_v45  ;;  %1318 = vmatprep.subr.msk.mxu0 %vm150_vm0, %v36_v46 }
  0x2e   :  { %1352 = vmatprep.subr.msk.mxu1 %vm150_vm0, %v68_v47 }
  0x2f   :  { %8 = vsyncpa [#allocation3], 0  ;;  %v35_v51 = vld [vmem:[%s2330_s0 + $0x98] sm:$0xff]  ;;  %147 = vperm.xlu0 %1435, %v144_v50   ;;  %v34_v55 = vld [vmem:[%s2330_s0 + $0x90] sm:$0xff] }
  0x30   :  { %v67_v52 = vld [vmem:[%s2330_s0 + $0x198] sm:$0xff]  ;;  %1319 = vmatpush3.xpose.msk.msra.mxu0 %vm150_vm0, %v20_v48  ;;  %v66_v56 = vld [vmem:[%s2330_s0 + $0x190] sm:$0xff]  ;;  %v33_v59 = vld [vmem:[%s2330_s0 + $0x88] sm:$0xff] }
  0x31   :  { %1353 = vmatpush3.xpose.msk.msra.mxu1 %vm150_vm0, %v52_v49  ;;  %1320 = vmatprep.subr.msk.mxu0 %vm150_vm0, %v35_v51  ;;  %v19_v53 = vld [vmem:[%s2330_s0 + $0x18] sm:$0xff]  ;;  %v18_v57 = vld [vmem:[%s2330_s0 + $0x10] sm:$0xff]  ;;  %v65_v60 = vld [vmem:[%s2330_s0 + $0x188] sm:$0xff] }
  0x32   :  { %1354 = vmatprep.subr.msk.mxu1 %vm150_vm0, %v67_v52  ;;  %v51_v54 = vld [vmem:[%s2330_s0 + $0x118] sm:$0xff]  ;;  %v50_v58 = vld [vmem:[%s2330_s0 + $0x110] sm:$0xff]  ;;  %v17_v61 = vld [vmem:[%s2330_s0 + $0x8] sm:$0xff] }
  0x33   :  { %v49_v62 = vld [vmem:[%s2330_s0 + $0x108] sm:$0xff]  ;;  %v32_v63 = vld [vmem:[%s2330_s0 + $0x80] sm:$0xff]  ;;  %v111_v3 = vld [vmem:[%s2330_s0 + $0x2f8] sm:$0xff] }
  0x34   :  { %1321 = vmatpush3.xpose.msk.msra.mxu0 %vm150_vm0, %v19_v53  ;;  %v64_v0 = vld [vmem:[%s2330_s0 + $0x180] sm:$0xff]  ;;  %v143_v4 = vld [vmem:[%s2330_s0 + $0x3f8] sm:$0xff]  ;;  %v110_v7 = vld [vmem:[%s2330_s0 + $0x2f0] sm:$0xff] }
  0x35   :  { %1355 = vmatpush3.xpose.msk.msra.mxu1 %vm150_vm0, %v51_v54  ;;  %1322 = vmatprep.subr.msk.mxu0 %vm150_vm0, %v34_v55  ;;  %v16_v1 = vld [vmem:[%s2330_s0] sm:$0xff]  ;;  %v95_v5 = vld [vmem:[%s2330_s0 + $0x278] sm:$0xff]  ;;  %v142_v8 = vld [vmem:[%s2330_s0 + $0x3f0] sm:$0xff] }
  0x36   :  { %1356 = vmatprep.subr.msk.mxu1 %vm150_vm0, %v66_v56  ;;  %v48_v2 = vld [vmem:[%s2330_s0 + $0x100] sm:$0xff]  ;;  %v127_v6 = vld [vmem:[%s2330_s0 + $0x378] sm:$0xff]  ;;  %v94_v9 = vld [vmem:[%s2330_s0 + $0x270] sm:$0xff] }
  0x37   :  { %v126_v10 = vld [vmem:[%s2330_s0 + $0x370] sm:$0xff]  ;;  %v109_v11 = vld [vmem:[%s2330_s0 + $0x2e8] sm:$0xff]  ;;  %v108_v15 = vld [vmem:[%s2330_s0 + $0x2e0] sm:$0xff] }
  0x38   :  { %1323 = vmatpush3.xpose.msk.msra.mxu0 %vm150_vm0, %v18_v57  ;;  %v141_v12 = vld [vmem:[%s2330_s0 + $0x3e8] sm:$0xff]  ;;  %v140_v16 = vld [vmem:[%s2330_s0 + $0x3e0] sm:$0xff]  ;;  %v107_v19 = vld [vmem:[%s2330_s0 + $0x2d8] sm:$0xff] }
  0x39   :  { %1357 = vmatpush3.xpose.msk.msra.mxu1 %vm150_vm0, %v50_v58  ;;  %1324 = vmatprep.subr.msk.mxu0 %vm150_vm0, %v33_v59  ;;  %v93_v13 = vld [vmem:[%s2330_s0 + $0x268] sm:$0xff]  ;;  %v92_v17 = vld [vmem:[%s2330_s0 + $0x260] sm:$0xff]  ;;  %v139_v20 = vld [vmem:[%s2330_s0 + $0x3d8] sm:$0xff] }
  0x3a   :  { %1358 = vmatprep.subr.msk.mxu1 %vm150_vm0, %v65_v60  ;;  %v125_v14 = vld [vmem:[%s2330_s0 + $0x368] sm:$0xff]  ;;  %v124_v18 = vld [vmem:[%s2330_s0 + $0x360] sm:$0xff]  ;;  %v91_v21 = vld [vmem:[%s2330_s0 + $0x258] sm:$0xff] }
  0x3b   :  { %v123_v22 = vld [vmem:[%s2330_s0 + $0x358] sm:$0xff]  ;;  %v106_v23 = vld [vmem:[%s2330_s0 + $0x2d0] sm:$0xff]  ;;  %v105_v28 = vld [vmem:[%s2330_s0 + $0x2c8] sm:$0xff] }
  0x3c   :  { %1325 = vmatpush3.xpose.msk.msra.mxu0 %vm150_vm0, %v17_v61  ;;  %v138_v24 = vld [vmem:[%s2330_s0 + $0x3d0] sm:$0xff]  ;;  %v137_v29 = vld [vmem:[%s2330_s0 + $0x3c8] sm:$0xff]  ;;  %v104_v32 = vld [vmem:[%s2330_s0 + $0x2c0] sm:$0xff] }
  0x3d   :  { %1359 = vmatpush3.xpose.msk.msra.mxu1 %vm150_vm0, %v49_v62  ;;  %1326 = vmatprep.subr.msk.mxu0 %vm150_vm0, %v32_v63  ;;  %v90_v25 = vld [vmem:[%s2330_s0 + $0x250] sm:$0xff]  ;;  %v89_v30 = vld [vmem:[%s2330_s0 + $0x248] sm:$0xff]  ;;  %v136_v33 = vld [vmem:[%s2330_s0 + $0x3c0] sm:$0xff] }
  0x3e   :  { %1360 = vmatprep.subr.msk.mxu1 %vm150_vm0, %v64_v0  ;;  %v122_v26 = vld [vmem:[%s2330_s0 + $0x350] sm:$0xff]  ;;  %v121_v31 = vld [vmem:[%s2330_s0 + $0x348] sm:$0xff]  ;;  %v88_v34 = vld [vmem:[%s2330_s0 + $0x240] sm:$0xff] }
  0x3f   :  { %v120_v35 = vld [vmem:[%s2330_s0 + $0x340] sm:$0xff]  ;;  %v103_v36 = vld [vmem:[%s2330_s0 + $0x2b8] sm:$0xff]  ;;  %v102_v40 = vld [vmem:[%s2330_s0 + $0x2b0] sm:$0xff] }
  0x40   :  { %1327 = vmatpush3.xpose.msk.msra.mxu0 %vm150_vm0, %v16_v1  ;;  %v135_v37 = vld [vmem:[%s2330_s0 + $0x3b8] sm:$0xff]  ;;  %v134_v41 = vld [vmem:[%s2330_s0 + $0x3b0] sm:$0xff]  ;;  %v101_v44 = vld [vmem:[%s2330_s0 + $0x2a8] sm:$0xff] }
  0x41   :  { %1361 = vmatpush3.xpose.msk.msra.mxu1 %vm150_vm0, %v48_v2  ;;  %1364 = vmatprep.subr.msk.mxu0 %vm150_vm0, %v111_v3  ;;  %v87_v38 = vld [vmem:[%s2330_s0 + $0x238] sm:$0xff]  ;;  %v86_v42 = vld [vmem:[%s2330_s0 + $0x230] sm:$0xff]  ;;  %v133_v45 = vld [vmem:[%s2330_s0 + $0x3a8] sm:$0xff] }
  0x42   :  { %1398 = vmatprep.subr.msk.mxu1 %vm150_vm0, %v143_v4  ;;  %v119_v39 = vld [vmem:[%s2330_s0 + $0x338] sm:$0xff]  ;;  %v118_v43 = vld [vmem:[%s2330_s0 + $0x330] sm:$0xff]  ;;  %v85_v46 = vld [vmem:[%s2330_s0 + $0x228] sm:$0xff] }
  0x43   :  { %1329 = vmatmul.mubr.msk.f32.vlgmr.msra.gmra.mxu0 %vm150_vm0, %v1632_v27  ;;  %v117_v47 = vld [vmem:[%s2330_s0 + $0x328] sm:$0xff]  ;;  %v100_v48 = vld [vmem:[%s2330_s0 + $0x2a0] sm:$0xff]  ;;  %v99_v52 = vld [vmem:[%s2330_s0 + $0x298] sm:$0xff] }
  0x44   :  { %1363 = vmatmul.mubr.msk.f32.vlgmr.msra.gmra.mxu1 %vm150_vm0, %v1632_v27  ;;  %1365 = vmatpush3.xpose.msk.msra.mxu0 %vm150_vm0, %v95_v5  ;;  %v132_v49 = vld [vmem:[%s2330_s0 + $0x3a0] sm:$0xff]  ;;  %v131_v53 = vld [vmem:[%s2330_s0 + $0x398] sm:$0xff]  ;;  %v98_v56 = vld [vmem:[%s2330_s0 + $0x290] sm:$0xff] }
  0x45   :  { %1399 = vmatpush3.xpose.msk.msra.mxu1 %vm150_vm0, %v127_v6  ;;  %1366 = vmatprep.subr.msk.mxu0 %vm150_vm0, %v110_v7  ;;  %v84_v50 = vld [vmem:[%s2330_s0 + $0x220] sm:$0xff]  ;;  %v83_v54 = vld [vmem:[%s2330_s0 + $0x218] sm:$0xff]  ;;  %v130_v57 = vld [vmem:[%s2330_s0 + $0x390] sm:$0xff] }
  0x46   :  { %1400 = vmatprep.subr.msk.mxu1 %vm150_vm0, %v142_v8  ;;  %1396 = vmatprep.mubr.msk.f32.mxu0 %vm150_vm0, %v1632_v27  ;;  %v116_v51 = vld [vmem:[%s2330_s0 + $0x320] sm:$0xff]  ;;  %v115_v55 = vld [vmem:[%s2330_s0 + $0x318] sm:$0xff]  ;;  %v82_v58 = vld [vmem:[%s2330_s0 + $0x210] sm:$0xff] }
  0x47   :  { %1430 = vmatprep.mubr.msk.f32.mxu1 %vm150_vm0, %v1632_v27  ;;  %v114_v59 = vld [vmem:[%s2330_s0 + $0x310] sm:$0xff]  ;;  %v97_v60 = vld [vmem:[%s2330_s0 + $0x288] sm:$0xff]  ;;  %v96_v0 = vld [vmem:[%s2330_s0 + $0x280] sm:$0xff] }
  0x48   :  { %1367 = vmatpush3.xpose.msk.msra.mxu0 %vm150_vm0, %v94_v9  ;;  %v129_v61 = vld [vmem:[%s2330_s0 + $0x388] sm:$0xff]  ;;  %v128_v1 = vld [vmem:[%s2330_s0 + $0x380] sm:$0xff] }
  0x49   :  { %1401 = vmatpush3.xpose.msk.msra.mxu1 %vm150_vm0, %v126_v10  ;;  %1368 = vmatprep.subr.msk.mxu0 %vm150_vm0, %v109_v11  ;;  %v81_v62 = vld [vmem:[%s2330_s0 + $0x208] sm:$0xff]  ;;  %v80_v2 = vld [vmem:[%s2330_s0 + $0x200] sm:$0xff] }
  0x4a   :  { %1402 = vmatprep.subr.msk.mxu1 %vm150_vm0, %v141_v12  ;;  %v113_v63 = vld [vmem:[%s2330_s0 + $0x308] sm:$0xff]  ;;  %v112_v3 = vld [vmem:[%s2330_s0 + $0x300] sm:$0xff]  ;;  %s1508_s0 = smov [#allocation2]  }
  0x4b   :  { %s1156_s16 = sshll.u32 %s1508_s0, 4  ;;  %s1157_s16 = int_to_ptr.vmem [resolvable:$true] %s1156_s16 }
  0x4c   :  { %1369 = vmatpush3.xpose.msk.msra.mxu0 %vm150_vm0, %v93_v13  ;;  %s1484_s17 = scalar_lea.vmem %s1157_s16, 128  ;;  %p1489_p1 = scmp.lt.s32.totalorder %s1157_s16, %s1157_s16 }
  0x4d   :  { %1403 = vmatpush3.xpose.msk.msra.mxu1 %vm150_vm0, %v125_v14  ;;  %1370 = vmatprep.subr.msk.mxu0 %vm150_vm0, %v108_v15  ;;  %p1485_p0 = scmp.ne.s32.totalorder %s1157_s16, %s1484_s17  ;;  %p1490_p2 = scmp.lt.s32.totalorder %s1484_s17, %s1484_s17 }
  0x4e   :  { %1404 = vmatprep.subr.msk.mxu1 %vm150_vm0, %v140_v16 }
  0x4f   :  { %p1491_p3 = por %p1490_p2, %p1489_p1 }
  0x50   :  { %1371 = vmatpush3.xpose.msk.msra.mxu0 %vm150_vm0, %v92_v17 }
  0x51   :  { %1405 = vmatpush3.xpose.msk.msra.mxu1 %vm150_vm0, %v124_v18  ;;  %1372 = vmatprep.subr.msk.mxu0 %vm150_vm0, %v107_v19  ;;  %p1492_p4 = pnand %p1491_p3, %p1485_p0 }
  0x52   :  { %1406 = vmatprep.subr.msk.mxu1 %vm150_vm0, %v139_v20 }
  0x54   :  { %1373 = vmatpush3.xpose.msk.msra.mxu0 %vm150_vm0, %v91_v21 }
  0x55   :  { %1407 = vmatpush3.xpose.msk.msra.mxu1 %vm150_vm0, %v123_v22  ;;  %1374 = vmatprep.subr.msk.mxu0 %vm150_vm0, %v106_v23  ;;  %v822_v22 = vlaneseq }
  0x56   :  { %1408 = vmatprep.subr.msk.mxu1 %vm150_vm0, %v138_v24 }
  0x58   :  { %1375 = vmatpush3.xpose.msk.msra.mxu0 %vm150_vm0, %v90_v25  ;;  %v2083_v25 = vshrl.u32 %v822_v22, 7 }
  0x59   :  { %1409 = vmatpush3.xpose.msk.msra.mxu1 %vm150_vm0, %v122_v26  ;;  %1376 = vmatprep.subr.msk.mxu0 %vm150_vm0, %v105_v28 }
  0x5a   :  { %1410 = vmatprep.subr.msk.mxu1 %vm150_vm0, %v137_v29  ;;  %vm824_vm1 = vcmp.lt.s32.totalorder %v2083_v25, 3 }
  0x5c   :  { %1377 = vmatpush3.xpose.msk.msra.mxu0 %vm150_vm0, %v89_v30 }
  0x5d   :  { %1411 = vmatpush3.xpose.msk.msra.mxu1 %vm150_vm0, %v121_v31  ;;  %1378 = vmatprep.subr.msk.mxu0 %vm150_vm0, %v104_v32 }
  0x5e   :  { %1412 = vmatprep.subr.msk.mxu1 %vm150_vm0, %v136_v33 }
  0x60   :  { %1379 = vmatpush3.xpose.msk.msra.mxu0 %vm150_vm0, %v88_v34 }
  0x61   :  { %1413 = vmatpush3.xpose.msk.msra.mxu1 %vm150_vm0, %v120_v35  ;;  %1380 = vmatprep.subr.msk.mxu0 %vm150_vm0, %v103_v36 }
  0x62   :  { %1414 = vmatprep.subr.msk.mxu1 %vm150_vm0, %v135_v37 }
  0x64   :  { %1381 = vmatpush3.xpose.msk.msra.mxu0 %vm150_vm0, %v87_v38 }
  0x65   :  { %1415 = vmatpush3.xpose.msk.msra.mxu1 %vm150_vm0, %v119_v39  ;;  %1382 = vmatprep.subr.msk.mxu0 %vm150_vm0, %v102_v40 }
  0x66   :  { %1416 = vmatprep.subr.msk.mxu1 %vm150_vm0, %v134_v41 }
  0x68   :  { %1383 = vmatpush3.xpose.msk.msra.mxu0 %vm150_vm0, %v86_v42 }
  0x69   :  { %1417 = vmatpush3.xpose.msk.msra.mxu1 %vm150_vm0, %v118_v43  ;;  %1384 = vmatprep.subr.msk.mxu0 %vm150_vm0, %v101_v44 }
  0x6a   :  { %1418 = vmatprep.subr.msk.mxu1 %vm150_vm0, %v133_v45 }
  0x6c   :  { %1385 = vmatpush3.xpose.msk.msra.mxu0 %vm150_vm0, %v85_v46 }
  0x6d   :  { %1419 = vmatpush3.xpose.msk.msra.mxu1 %vm150_vm0, %v117_v47  ;;  %1386 = vmatprep.subr.msk.mxu0 %vm150_vm0, %v100_v48 }
  0x6e   :  { %1420 = vmatprep.subr.msk.mxu1 %vm150_vm0, %v132_v49 }
  0x70   :  { %1387 = vmatpush3.xpose.msk.msra.mxu0 %vm150_vm0, %v84_v50 }
  0x71   :  { %1421 = vmatpush3.xpose.msk.msra.mxu1 %vm150_vm0, %v116_v51  ;;  %1388 = vmatprep.subr.msk.mxu0 %vm150_vm0, %v99_v52 }
  0x72   :  { %1422 = vmatprep.subr.msk.mxu1 %vm150_vm0, %v131_v53 }
  0x74   :  { %1389 = vmatpush3.xpose.msk.msra.mxu0 %vm150_vm0, %v83_v54 }
  0x75   :  { %1423 = vmatpush3.xpose.msk.msra.mxu1 %vm150_vm0, %v115_v55  ;;  %1390 = vmatprep.subr.msk.mxu0 %vm150_vm0, %v98_v56 }
  0x76   :  { %1424 = vmatprep.subr.msk.mxu1 %vm150_vm0, %v130_v57 }
  0x78   :  { %1391 = vmatpush3.xpose.msk.msra.mxu0 %vm150_vm0, %v82_v58 }
  0x79   :  { %1425 = vmatpush3.xpose.msk.msra.mxu1 %vm150_vm0, %v114_v59  ;;  %1392 = vmatprep.subr.msk.mxu0 %vm150_vm0, %v97_v60 }
  0x7a   :  { %1426 = vmatprep.subr.msk.mxu1 %vm150_vm0, %v129_v61 }
  0x7c   :  { %1393 = vmatpush3.xpose.msk.msra.mxu0 %vm150_vm0, %v81_v62 }
  0x7d   :  { %1427 = vmatpush3.xpose.msk.msra.mxu1 %vm150_vm0, %v113_v63  ;;  %1394 = vmatprep.subr.msk.mxu0 %vm150_vm0, %v96_v0  ;;  %v1507_v0 = vmov 1966171168  }
  0x7e   :  { %1428 = vmatprep.subr.msk.mxu1 %vm150_vm0, %v128_v1  ;;  %v2132_v1 = vunpack.c.l.s4 %v1507_v0 }
  0x80   :  { %1395 = vmatpush3.xpose.msk.msra.mxu0 %vm150_vm0, %v80_v2 }
  0x81   :  { %1429 = vmatpush3.xpose.msk.msra.mxu1 %vm150_vm0, %v112_v3 }
  0x83   :  { %1397 = vmatmul.mubr.msk.f32.vlgmr.msra.gmra.mxu0 %vm150_vm0, %v1632_v27 }
  0x84   :  { %1431 = vmatmul.mubr.msk.f32.vlgmr.msra.gmra.mxu1 %vm150_vm0, %v1632_v27 }
  0xaa   :  { %v2065_v5 = vpop.permute.xlu0 %147 }
 0x103   :  { %v604_v4 = vpop.f32.mrf.mxu0 }
 0x104   :  { %v675_v7 = vpop.f32.mrf.mxu1  ;;  %v2068_v8 = vadd.f32 %v604_v4, %v2065_v5 }
 0x105   :  { %v606_v6 = vpop.f32.mrf.mxu0  ;;  %v2075_v12 = vadd.f32 %v675_v7, %v2065_v5 }
 0x106   :  { %v2071_v9 = vadd.f32 %v606_v6, %v2065_v5  ;;  %v677_v10 = vpop.f32.mrf.mxu1  ;;  %v931_v11 = vand.u32 2147483647, %v2068_v8  ;;  %v825_v26 = vmax.f32 %v2068_v8, 0.0  ;;  %vm915_vm3 = vcmp.ne.f32.partialorder %v2068_v8, %v2068_v8 }
 0x107   :  { %v2079_v27 = vadd.f32 %v677_v10, %v2065_v5  ;;  %v933_v15 = vand.u32 2147483647, %v2075_v12  ;;  %v827_v28 = vmax.f32 %v2075_v12, 0.0  ;;  %vm917_vm6 = vcmp.ne.f32.partialorder %v2075_v12, %v2075_v12 }
 0x108   :  { %v932_v13 = vand.u32 2147483647, %v2071_v9  ;;  %v939_v14 = vsub.f32 0.0, %v931_v11  ;;  %v835_v29 = vsel %vm824_vm1, %v825_v26, 0.0  ;;  %v826_v34 = vmax.f32 %v2071_v9, 0.0 }
 0x109   :  { %v934_v17 = vand.u32 2147483647, %v2079_v27  ;;  %v941_v19 = vsub.f32 0.0, %v933_v15  ;;  %v843_v32 = vrot.slane %v835_v29, 4  ;;  %v837_v33 = vsel %vm824_vm1, %v827_v28, 0.0 }
 0x10a   :  { %v940_v16 = vsub.f32 0.0, %v932_v13  ;;  %v947_v18 = vmul.f32 1.442695, %v939_v14  ;;  %v855_v37 = vrot.slane %v837_v33, 4  ;;  %v836_v40 = vsel %vm824_vm1, %v826_v34, 0.0 }
 0x10b   :  { %v942_v21 = vsub.f32 0.0, %v934_v17  ;;  %v951_v23 = vmul.f32 1.442695, %v941_v19  ;;  %v844_v39 = vadd.f32 %v843_v32, %v835_v29  ;;  %v828_v41 = vmax.f32 %v2079_v27, 0.0 }
 0x10c   :  { %v949_v20 = vmul.f32 1.442695, %v940_v16  ;;  %1436 = vpow2.f32 %v947_v18  ;;  %v856_v44 = vadd.f32 %v855_v37, %v837_v33  ;;  %v849_v45 = vrot.slane %v836_v40, 4 }
 0x10d   :  { %v953_v24 = vmul.f32 1.442695, %v942_v21  ;;  %v845_v46 = vrot.slane %v844_v39, 2  ;;  %v838_v47 = vsel %vm824_vm1, %v828_v41, 0.0  ;;  %v1105_v19 = vunpack.c.0.s8 %v2132_v1 }
 0x10e   :  { %1438 = vpow2.f32 %v949_v20  ;;  %v857_v54 = vrot.slane %v856_v44, 2  ;;  %v850_v55 = vadd.f32 %v849_v45, %v836_v40  ;;  %v861_v56 = vrot.slane %v838_v47, 4 }
 0x10f   :  { %1440 = vpow2.f32 %v951_v23  ;;  %v846_v58 = vadd.f32 %v845_v46, %v844_v39  ;;  %vm916_vm4 = vcmp.ne.f32.partialorder %v2071_v9, %v2071_v9  ;;  %vm918_vm9 = vcmp.ne.f32.partialorder %v2079_v27, %v2079_v27 }
 0x110   :  { %1442 = vpow2.f32 %v953_v24  ;;  %v858_v2 = vadd.f32 %v857_v54, %v856_v44  ;;  %v851_v3 = vrot.slane %v850_v55, 2  ;;  %v862_v4 = vadd.f32 %v861_v56, %v838_v47 }
 0x111   :  { %1444 = vtanh.f32 %v2068_v8  ;;  %v847_v11 = vrot.slane %v846_v58, 1 }
 0x112   :  { %1446 = vtanh.f32 %v2075_v12  ;;  %v852_v21 = vadd.f32 %v851_v3, %v850_v55  ;;  %v863_v22 = vrot.slane %v862_v4, 2  ;;  %v859_v23 = vrot.slane %v858_v2, 1 }
 0x114   :  { %v853_v56 = vrot.slane %v852_v21, 1 }
 0x119   :  { %v2092_v30 = vpop.eup %1436 }
 0x11a   :  { %v963_v35 = vadd.f32 1.0, %v2092_v30  ;;  %v966_v14 = vmul.f32 -0.5, %v2092_v30  ;;  %v969_v29 = vand.u32 2147483647, %v2092_v30 }
 0x11b   :  { %v2094_v31 = vpop.eup %1438 }
 0x11c   :  { %v2102_v36 = vpop.eup %1440  ;;  %v972_v38 = vadd.f32 1.0, %v2094_v31  ;;  %1448 = vlog2.f32 %v963_v35  ;;  %v975_v15 = vmul.f32 -0.5, %v2094_v31  ;;  %v2144_v35 = vadd.f32 %v847_v11, %v846_v58 }
 0x11d   :  { %v2111_v42 = vpop.eup %1442  ;;  %v981_v43 = vadd.f32 1.0, %v2102_v36  ;;  %v984_v32 = vmul.f32 -0.5, %v2102_v36  ;;  %v967_v37 = vadd.f32 1.0, %v966_v14  ;;  %v978_v44 = vand.u32 2147483647, %v2094_v31 }
 0x11e   :  { %1450 = vlog2.f32 %v972_v38  ;;  %v990_v48 = vadd.f32 1.0, %v2111_v42  ;;  %v1445_v13 = vpop.eup %1444  ;;  %v976_v38 = vadd.f32 1.0, %v975_v15  ;;  %v993_v45 = vmul.f32 -0.5, %v2111_v42 }
 0x11f   :  { %1452 = vtanh.f32 %v2071_v9  ;;  %v1447_v17 = vpop.eup %1446  ;;  %vm2153_vm2 = vcmp.lt.f32.partialorder %v969_v29, 0.0004427343  ;;  %v985_v54 = vadd.f32 1.0, %v984_v32  ;;  %v987_v55 = vand.u32 2147483647, %v2102_v36 }
 0x120   :  { %1454 = vlog2.f32 %v981_v43  ;;  %v2147_v43 = vmul.f32 0.1, %v1447_v17  ;;  %v968_v58 = vmul.f32 %v2092_v30, %v967_v37  ;;  %vm2165_vm5 = vcmp.lt.f32.partialorder %v978_v44, 0.0004427343 }
 0x121   :  { %1456 = vlog2.f32 %v990_v48  ;;  %v994_v3 = vadd.f32 1.0, %v993_v45  ;;  %vm2178_vm7 = vcmp.lt.f32.partialorder %v987_v55, 0.0004427343  ;;  %v854_v15 = vadd.f32 %v853_v56, %v852_v21 }
 0x129   :  { %v1449_v20 = vpop.eup %1448 }
 0x12a   :  { %v965_v47 = vmul.f32 0.6931472, %v1449_v20 }
 0x12b   :  { %v1451_v24 = vpop.eup %1450 }
 0x12c   :  { %v1453_v40 = vpop.eup %1452  ;;  %v974_v48 = vmul.f32 0.6931472, %v1451_v24 }
 0x12d   :  { %v1455_v46 = vpop.eup %1454 }
 0x143   :  { %v746_v49 = vpop.f32.mrf.mxu0 }
 0x144   :  { %v817_v50 = vpop.f32.mrf.mxu1  ;;  %v2122_v51 = vadd.f32 %v746_v49, %v2065_v5 }
 0x145   :  { %v2125_v52 = vadd.f32 %v817_v50, %v2065_v5  ;;  %v748_v53 = vpop.f32.mrf.mxu0  ;;  %v2151_v50 = vadd.f32 %v859_v23, %v858_v2  ;;  %v864_v2 = vadd.f32 %v863_v22, %v862_v4  ;;  %v995_v23 = vmul.f32 %v2111_v42, %v994_v3 }
 0x146   :  { %v935_v57 = vand.u32 2147483647, %v2122_v51  ;;  %v2130_v61 = vadd.f32 %v748_v53, %v2065_v5  ;;  %v819_v63 = vpop.f32.mrf.mxu1  ;;  %vm919_vm11 = vcmp.ne.f32.partialorder %v2122_v51, %v2122_v51 }
 0x147   :  { %v937_v59 = vand.u32 2147483647, %v2125_v52  ;;  %v2138_v16 = vadd.f32 %v819_v63, %v2065_v5  ;;  %v899_v5 = vmul.f32 0.1, %v1445_v13  ;;  %v983_v63 = vmul.f32 0.6931472, %v1455_v46 }
 0x148   :  { %v943_v60 = vsub.f32 0.0, %v935_v57  ;;  %v936_v10 = vand.u32 2147483647, %v2130_v61  ;;  %v1457_v57 = vpop.eup %1456  ;;  %v830_v13 = vmax.f32 %v2130_v61, 0.0  ;;  %v831_v29 = vmax.f32 %v2125_v52, 0.0 }
 0x149   :  { %v945_v62 = vsub.f32 0.0, %v937_v59  ;;  %v938_v39 = vand.u32 2147483647, %v2138_v16  ;;  %v977_v59 = vmul.f32 %v2094_v31, %v976_v38  ;;  %v986_v31 = vmul.f32 %v2102_v36, %v985_v54 }
 0x14a   :  { %v955_v6 = vmul.f32 1.442695, %v943_v60  ;;  %v944_v18 = vsub.f32 0.0, %v936_v10  ;;  %v996_v60 = vand.u32 2147483647, %v2111_v42  ;;  %v907_v17 = vadd.f32 1.0, %v899_v5 }
 0x14b   :  { %v959_v7 = vmul.f32 1.442695, %v945_v62  ;;  %v946_v49 = vsub.f32 0.0, %v938_v39  ;;  %v980_v30 = vsel %vm2165_vm5, %v977_v59, %v974_v48  ;;  %v900_v10 = vmul.f32 0.1, %v1453_v40 }
 0x14c   :  { %1458 = vpow2.f32 %v955_v6  ;;  %v957_v33 = vmul.f32 1.442695, %v944_v18  ;;  %v971_v6 = vsel %vm2153_vm2, %v968_v58, %v965_v47  ;;  %v992_v11 = vmul.f32 0.6931472, %v1457_v57 }
 0x14d   :  { %1460 = vpow2.f32 %v959_v7  ;;  %v961_v62 = vmul.f32 1.442695, %v946_v49  ;;  %v829_v7 = vmax.f32 %v2122_v51, 0.0  ;;  %vm2182_vm8 = vcmp.lt.f32.partialorder %v996_v60, 0.0004427343 }
 0x14e   :  { %1462 = vtanh.f32 %v2079_v27  ;;  %v1035_v36 = vadd.f32 %v971_v6, %v825_v26  ;;  %v989_v20 = vsel %vm2178_vm7, %v986_v31, %v983_v63  ;;  %v1036_v22 = vadd.f32 %v980_v30, %v826_v34 }
 0x14f   :  { %1464 = vpow2.f32 %v957_v33  ;;  %v839_v21 = vsel %vm824_vm1, %v829_v7, 0.0  ;;  %v998_v34 = vsel %vm2182_vm8, %v995_v23, %v992_v11  ;;  %v840_v42 = vsel %vm824_vm1, %v830_v13, 0.0 }
 0x150   :  { %1466 = vpow2.f32 %v961_v62  ;;  %v908_v5 = vadd.f32 1.0, %v900_v10  ;;  %v1037_v37 = vadd.f32 %v989_v20, %v827_v28  ;;  %v832_v38 = vmax.f32 %v2138_v16, 0.0 }
 0x151   :  { %1468 = vtanh.f32 %v2130_v61  ;;  %v865_v39 = vrot.slane %v864_v2, 1  ;;  %v1043_v40 = vsel %vm915_vm3, %v2068_v8, %v1035_v36  ;;  %v1044_v44 = vsel %vm916_vm4, %v2071_v9, %v1036_v22 }
 0x152   :  { %v867_v45 = vrot.slane %v839_v21, 4  ;;  %v1038_v28 = vadd.f32 %v998_v34, %v828_v41  ;;  %v841_v47 = vsel %vm824_vm1, %v831_v29, 0.0  ;;  %v873_v8 = vrot.slane %v840_v42, 4 }
 0x153   :  { %v909_v9 = vadd.f32 1.0, %v2147_v43  ;;  %v1052_v53 = vmul.f32 %v908_v5, %v854_v15  ;;  %v1067_v54 = vrot.slane %v1043_v40, 1  ;;  %v1068_v55 = vrot.slane %v1044_v44, 1 }
 0x154   :  { %v842_v41 = vsel %vm824_vm1, %v832_v38, 0.0  ;;  %v1045_v56 = vsel %vm917_vm6, %v2075_v12, %v1037_v37  ;;  %v868_v57 = vadd.f32 %v867_v45, %v839_v21  ;;  %v879_v58 = vrot.slane %v841_v47, 4 }
 0x155   :  { %v1046_v43 = vsel %vm918_vm9, %v2079_v27, %v1038_v28  ;;  %v874_v60 = vadd.f32 %v873_v8, %v840_v42  ;;  %v885_v63 = vrot.slane %v842_v41, 4  ;;  %v866_v0 = vadd.f32 %v865_v39, %v864_v2 }
 0x156   :  { %v1051_v12 = vmul.f32 %v907_v17, %v2144_v35  ;;  %v1069_v6 = vrot.slane %v1045_v56, 1  ;;  %v2255_v10 = vadd.f32 %v1068_v55, %v1052_v53  ;;  %v1070_v27 = vrot.slane %v1046_v43, 1 }
 0x157   :  { %v869_v11 = vrot.slane %v868_v57, 2  ;;  %v880_v4 = vadd.f32 %v879_v58, %v841_v47  ;;  %v1053_v14 = vmul.f32 %v909_v9, %v2151_v50  ;;  %v875_v36 = vrot.slane %v874_v60, 2 }
 0x158   :  { %v2258_v20 = vadd.f32 %v1067_v54, %v1051_v12  ;;  %v886_v22 = vadd.f32 %v885_v63, %v842_v41  ;;  %v2269_v50 = vsub.s32 %v1105_v19, %v2083_v25  ;;  %vm921_vm12 = vcmp.ne.f32.partialorder %v2125_v52, %v2125_v52 }
 0x159   :  { %v2186_v18 = vpop.eup %1458  ;;  %v881_v42 = vrot.slane %v880_v4, 2  ;;  %v876_v45 = vadd.f32 %v875_v36, %v874_v60  ;;  %vm920_vm14 = vcmp.ne.f32.partialorder %v2130_v61, %v2130_v61  ;;  %vm922_vm1 = vcmp.ne.f32.partialorder %v2138_v16, %v2138_v16 }
 0x15a   :  { %v2197_v24 = vpop.eup %1460  ;;  %v999_v26 = vadd.f32 1.0, %v2186_v18  ;;  %v1002_v59 = vmul.f32 -0.5, %v2186_v18  ;;  %v1005_v35 = vand.u32 2147483647, %v2186_v18  ;;  %v887_v1 = vrot.slane %v886_v22, 2 }
 0x15b   :  { %v1463_v32 = vpop.eup %1462  ;;  %v1017_v33 = vadd.f32 1.0, %v2197_v24  ;;  %v1020_v30 = vmul.f32 -0.5, %v2197_v24  ;;  %v1023_v5 = vand.u32 2147483647, %v2197_v24  ;;  %v882_v41 = vadd.f32 %v881_v42, %v880_v4 }
 0x15c   :  { %1470 = vlog2.f32 %v999_v26  ;;  %v2224_v46 = vpop.eup %1464  ;;  %v902_v48 = vmul.f32 0.1, %v1463_v32  ;;  %v1003_v15 = vadd.f32 1.0, %v1002_v59  ;;  %v2262_v26 = vadd.f32 %v1069_v6, %v1053_v14 }
 0x15d   :  { %1472 = vlog2.f32 %v1017_v33  ;;  %v1008_v49 = vadd.f32 1.0, %v2224_v46  ;;  %v2250_v62 = vpop.eup %1466  ;;  %v1011_v17 = vmul.f32 -0.5, %v2224_v46  ;;  %v1021_v21 = vadd.f32 1.0, %v1020_v30 }
 0x15e   :  { %1474 = vtanh.f32 %v2122_v51  ;;  %v910_v3 = vadd.f32 1.0, %v902_v48  ;;  %v1026_v31 = vadd.f32 1.0, %v2250_v62  ;;  %v1469_v2 = vpop.eup %1468  ;;  %v1099_v32 = vcombine.low %v2258_v20, %v2255_v10 }
 0x15f   :  { %1476 = vtanh.f32 %v2125_v52  ;;  %v870_v33 = vadd.f32 %v869_v11, %v868_v57  ;;  %v1004_v44 = vmul.f32 %v2186_v18, %v1003_v15  ;;  %v904_v28 = vmul.f32 0.1, %v1469_v2 }
 0x160   :  { %1478 = vlog2.f32 %v1008_v49  ;;  %v1054_v23 = vmul.f32 %v910_v3, %v866_v0  ;;  %vm1006_vm10 = vcmp.lt.f32.partialorder %v1005_v35, 0.0004427343  ;;  %v1012_v48 = vadd.f32 1.0, %v1011_v17 }
 0x161   :  { %1480 = vtanh.f32 %v2138_v16  ;;  %v1022_v19 = vmul.f32 %v2197_v24, %v1021_v21  ;;  %v1014_v49 = vand.u32 2147483647, %v2224_v46  ;;  %v1029_v9 = vmul.f32 -0.5, %v2250_v62 }
 0x162   :  { %1482 = vlog2.f32 %v1026_v31  ;;  %v2272_v37 = vadd.f32 %v1070_v27, %v1054_v23  ;;  %vm2284_vm13 = vcmp.lt.f32.partialorder %v1023_v5, 0.0004427343  ;;  %v871_v57 = vrot.slane %v870_v33, 1 }
 0x163   :  { %v1013_v59 = vmul.f32 %v2224_v46, %v1012_v48  ;;  %v888_v60 = vadd.f32 %v887_v1, %v886_v22  ;;  %vm1015_vm15 = vcmp.lt.f32.partialorder %v1014_v49, 0.0004427343  ;;  %v1030_v63 = vadd.f32 1.0, %v1029_v9 }
 0x164   :  { %v912_v0 = vadd.f32 1.0, %v904_v28  ;;  %v1032_v30 = vand.u32 2147483647, %v2250_v62  ;;  %v872_v14 = vadd.f32 %v871_v57, %v870_v33  ;;  %v883_v36 = vrot.slane %v882_v41, 1 }
 0x165   :  { %v889_v2 = vrot.slane %v888_v60, 1  ;;  %v1031_v17 = vmul.f32 %v2250_v62, %v1030_v63  ;;  %v1100_v62 = vcombine.low %v2262_v26, %v2272_v37 }
 0x166   :  { %vm1033_vm0 = vcmp.lt.f32.partialorder %v1032_v30, 0.0004427343 }
 0x169   :  { %v1471_v34 = vpop.eup %1470 }
 0x16a   :  { %v1473_v39 = vpop.eup %1472  ;;  %v1001_v40 = vmul.f32 0.6931472, %v1471_v34 }
 0x16b   :  { %v1475_v47 = vpop.eup %1474  ;;  %v1019_v8 = vmul.f32 0.6931472, %v1473_v39 }
 0x16c   :  { %v1007_v25 = vsel %vm1006_vm10, %v1004_v44, %v1001_v40  ;;  %v1477_v53 = vpop.eup %1476  ;;  %v903_v24 = vmul.f32 0.1, %v1475_v47  ;;  %v884_v40 = vadd.f32 %v883_v36, %v882_v41 }
 0x16d   :  { %v1039_v18 = vadd.f32 %v1007_v25, %v829_v7  ;;  %v1479_v55 = vpop.eup %1478  ;;  %v1025_v56 = vsel %vm2284_vm13, %v1022_v19, %v1019_v8  ;;  %v877_v7 = vrot.slane %v876_v45, 1  ;;  %v905_v46 = vmul.f32 0.1, %v1477_v53 }
 0x16e   :  { %v1481_v58 = vpop.eup %1480  ;;  %v1010_v43 = vmul.f32 0.6931472, %v1479_v55  ;;  %v1041_v12 = vadd.f32 %v1025_v56, %v831_v29  ;;  %v911_v11 = vadd.f32 1.0, %v903_v24  ;;  %v1116_v19 = vrot.slane %v1100_v62, %v2269_v50 }
 0x16f   :  { %v1047_v3 = vsel %vm919_vm11, %v2122_v51, %v1039_v18  ;;  %v906_v27 = vmul.f32 0.1, %v1481_v58  ;;  %v1483_v4 = vpop.eup %1482  ;;  %v878_v15 = vadd.f32 %v877_v7, %v876_v45  ;;  %v913_v34 = vadd.f32 1.0, %v905_v46 }
 0x170   :  { %v1016_v6 = vsel %vm1015_vm15, %v1013_v59, %v1010_v43  ;;  %v1071_v35 = vrot.slane %v1047_v3, 1  ;;  %v1028_v29 = vmul.f32 0.6931472, %v1483_v4  ;;  %v1055_v42 = vmul.f32 %v911_v11, %v872_v14 }
 0x171   :  { %v1040_v31 = vadd.f32 %v1016_v6, %v830_v13  ;;  %v1049_v13 = vsel %vm921_vm12, %v2125_v52, %v1041_v12  ;;  %v1056_v23 = vmul.f32 %v912_v0, %v878_v15  ;;  %v914_v33 = vadd.f32 1.0, %v906_v27 }
 0x172   :  { %v1034_v21 = vsel %vm1033_vm0, %v1031_v17, %v1028_v29  ;;  %v1073_v39 = vrot.slane %v1049_v13, 1  ;;  %v890_v52 = vadd.f32 %v889_v2, %v888_v60  ;;  %v1087_v44 = vadd.f32 %v1071_v35, %v1055_v42 }
 0x173   :  { %v1048_v51 = vsel %vm920_vm14, %v2130_v61, %v1040_v31  ;;  %v1042_v61 = vadd.f32 %v1034_v21, %v832_v38  ;;  %v1057_v47 = vmul.f32 %v913_v34, %v884_v40  ;;  %v1109_v38 = vrot.slane %v1099_v32, %v2269_v50 }
 0x174   :  { %v1072_v22 = vrot.slane %v1048_v51, 1  ;;  %v1058_v8 = vmul.f32 %v914_v33, %v890_v52 }
 0x175   :  { %v1050_v45 = vsel %vm922_vm1, %v2138_v16, %v1042_v61  ;;  %v1089_v1 = vadd.f32 %v1073_v39, %v1057_v47  ;;  %v1131_v9 = vcombine.high %v1109_v38, %v1116_v19 }
 0x176   :  { %v1088_v5 = vadd.f32 %v1072_v22, %v1056_v23  ;;  %v1074_v28 = vrot.slane %v1050_v45, 1 }
 0x177   :  { %v1139_v53 = vrot.slane %v1131_v9, %v2269_v50 }
 0x178   :  { %v1101_v48 = vcombine.low %v1087_v44, %v1088_v5  ;;  %v1090_v25 = vadd.f32 %v1074_v28, %v1058_v8 }
 0x17a   :  { %v1102_v26 = vcombine.low %v1089_v1, %v1090_v25  ;;  %v1123_v37 = vrot.slane %v1101_v48, %v2269_v50 }
 0x17c   :  { %v1130_v49 = vrot.slane %v1102_v26, %v2269_v50 }
 0x17e   :  { %v1132_v16 = vcombine.high %v1123_v37, %v1130_v49 }
 0x180   :  { %v1146_v18 = vrot.slane %v1132_v16, %v2269_v50 }
 0x182   :  { %v1147_v54 = vcombine.high %v1139_v53, %v1146_v18 }
 0x184   :  { %1149 = vst [vmem:[#allocation2] sm:$0xff] %v1147_v54 }
 0x185   :  { %1495 = shalt.err (!%p1492_p4)
}
 0x186   :  { %1159 = dma.vmem_to_hbm [thread:$0]  %s1157_s16, 128, %s2333_s3, [#allocation3]  }
 0x187   :  { %1504 = dma.done.wait [#allocation3], 128  }
 0x188   :  { %1505 = vsyncadd [#allocation3], 4294967168 }
 0x189   :  { %1163 = vsyncpa [#allocation3], 1 }

</bundles_post_ra>
